<compile_context>
chip_gen: v6e
topology: v6e:2x2x1
jax: 0.10.0
libtpu: 0.0.40
codegen_flags: <defaults>
</compile_context>

<pallas_src>
import functools

import jax
import jax.numpy as jnp
from jax import lax
from jax.experimental import pallas as pl
from jax.experimental.pallas import tpu as pltpu

EPS = 1e-5
NEG_SLOPE = 0.2


def _unet_down_kernel(p_ref, w_ref, o_ref, sum_ref, ssq_ref, *,
                      hw_total, hw_tile, num_hw_tiles):
    # p_ref:   (1, hw_tile, K)   bf16 patch tile
    # w_ref:   (K, Cp)           bf16 flattened conv weight (full Cout, padded)
    # o_ref:   (1, HW, Cp)       resident output block (f32), revisited over t
    # sum_ref / ssq_ref: (1, Cp) f32 streamed instance-norm stats
    t = pl.program_id(1)

    @pl.when(t == 0)
    def _init():
        sum_ref[...] = jnp.zeros_like(sum_ref)
        ssq_ref[...] = jnp.zeros_like(ssq_ref)

    # Conv tile as an MXU matmul: bf16 inputs, f32 accumulation.
    y = jnp.dot(p_ref[0], w_ref[...],
                preferred_element_type=jnp.float32)           # (hw_tile, Cp)

    # Single-pass per-channel statistics (sum and sum of squares).
    sum_ref[...] += jnp.sum(y, axis=0, keepdims=True)
    ssq_ref[...] += jnp.sum(y * y, axis=0, keepdims=True)

    # Stash the raw conv output into the resident output block.
    row0 = pl.multiple_of(t * hw_tile, hw_tile)
    o_ref[0, pl.ds(row0, hw_tile), :] = y.astype(o_ref.dtype)

    @pl.when(t == num_hw_tiles - 1)
    def _finalize():
        cp = o_ref.shape[-1]
        inv_hw = jnp.float32(1.0 / hw_total)
        mean = sum_ref[...] * inv_hw                          # (1, Cp)
        # Biased variance; clamp to >= 0 (E[x^2]-E[x]^2 can dip negative in f32).
        var = jnp.maximum(ssq_ref[...] * inv_hw - mean * mean, 0.0)
        scale = lax.rsqrt(var + EPS)

        # Hoist the (1,Cp)->(hw_tile,Cp) broadcasts out of the loop (JAX does
        # not CSE broadcast_in_dim; the epilogue is on the critical path).
        mean_b = jnp.broadcast_to(mean, (hw_tile, cp))
        scale_b = jnp.broadcast_to(scale, (hw_tile, cp))

        def _norm_tile(i, carry):
            r0 = pl.multiple_of(i * hw_tile, hw_tile)
            blk = o_ref[0, pl.ds(r0, hw_tile), :].astype(jnp.float32)
            yn = (blk - mean_b) * scale_b
            out = jnp.where(yn >= 0.0, yn, NEG_SLOPE * yn)
            o_ref[0, pl.ds(r0, hw_tile), :] = out.astype(o_ref.dtype)
            return carry

        unroll = num_hw_tiles if num_hw_tiles <= 8 else 4
        lax.fori_loop(0, num_hw_tiles, _norm_tile, 0, unroll=unroll)


def _im2col(x, k=4, s=2, p=1):
    # x: (N, C, H, W) -> patches (N, Ho*Wo, C*k*k), PyTorch weight ordering.
    N, C, H, W = x.shape
    Ho, Wo = (H + 2 * p - k) // s + 1, (W + 2 * p - k) // s + 1
    xp = jnp.pad(x, ((0, 0), (0, 0), (p, p), (p, p)))
    rows = []
    for kh in range(k):
        for kw in range(k):
            rows.append(xp[:, :, kh:kh + s * Ho:s, kw:kw + s * Wo:s])  # (N,C,Ho,Wo)
    pat = jnp.stack(rows, axis=0)                    # (k*k, N, C, Ho, Wo)
    pat = jnp.transpose(pat, (1, 3, 4, 2, 0))        # (N, Ho, Wo, C, k*k)
    return pat.reshape(N, Ho * Wo, C * k * k), Ho, Wo


def _pick_hw_tile(hw, k, *, max_tile=2048, target_bytes=4 << 20):
    """Largest divisor of hw that is a multiple of 16 (bf16 sublane packing),
    <= max_tile and whose bf16 (tile, K) patch block fits the byte target.
    Falls back to multiples of 8, then to the full extent."""
    def _scan(step):
        best, t = None, step
        while t <= min(hw, max_tile):
            if hw % t == 0 and t * k * 2 <= target_bytes:
                best = t
            t += step
        return best

    best = _scan(16)
    if best is None:
        best = _scan(8)
    return best if best is not None else hw


def unet_down(x, weight, *, hw_tile=None, channels_last_out=False):
    """x: (N, Cin, H, W) f32;  weight: (Cout, Cin, 4, 4) f32.

    Returns (N, Cout, H//2, W//2) (PyTorch NCHW) by default.  Pass
    channels_last_out=True to get (N, Ho, Wo, Cout) and skip the trailing
    transpose when chaining UNetDown blocks (the transpose is a full extra
    HBM round trip of the output on an already HBM-bound op).
    """
    N, Cin, H, W = x.shape
    Cout = weight.shape[0]

    patches, Ho, Wo = _im2col(x)
    HW, K = patches.shape[1], patches.shape[2]
    patches = patches.astype(jnp.bfloat16)

    # Pad Cout up to a full 128-lane width for narrow layers; zero-weight
    # columns are free on the MXU and sliced off after the kernel.
    Cp = 128 if Cout < 128 else Cout
    w_flat = weight.reshape(Cout, Cin * 16).T.astype(jnp.bfloat16)     # (K, Cout)
    if Cp != Cout:
        w_flat = jnp.pad(w_flat, ((0, 0), (0, Cp - Cout)))             # (K, Cp)

    if hw_tile is None:
        hw_tile = _pick_hw_tile(HW, K)
    assert HW % hw_tile == 0 and (hw_tile % 8 == 0 or hw_tile == HW), (HW, hw_tile)
    n_t = HW // hw_tile

    kernel = functools.partial(_unet_down_kernel, hw_total=HW,
                               hw_tile=hw_tile, num_hw_tiles=n_t)

    cost = pl.CostEstimate(
        flops=2 * N * HW * K * Cp,
        transcendentals=0,
        bytes_accessed=int(patches.size * 2 + w_flat.size * 2
                           + N * HW * Cp * 4))

    # Note: the resident output block is kept in f32 to preserve the module's
    # f32 forward semantics; for very large early layers on v7x a bf16
    # resident block / output would halve this term.
    vmem_need = (2 * hw_tile * K * 2        # double-buffered bf16 patch tile
                 + 2 * K * Cp * 2           # weight block buffers (bf16)
                 + 2 * HW * Cp * 4          # resident output block (f32)
                 + 4 * hw_tile * Cp * 4)    # matmul / elementwise temporaries
    vmem_limit = int(min(max(int(1.5 * vmem_need), 32 * 1024 * 1024),
                         48 * 1024 * 1024))

    out = pl.pallas_call(
        kernel,
        out_shape=jax.ShapeDtypeStruct((N, HW, Cp), x.dtype),
        grid_spec=pltpu.PrefetchScalarGridSpec(
            num_scalar_prefetch=0,
            grid=(N, n_t),
            in_specs=[
                pl.BlockSpec((1, hw_tile, K), lambda n, t: (n, t, 0)),
                pl.BlockSpec((K, Cp), lambda n, t: (0, 0)),
            ],
            out_specs=pl.BlockSpec((1, HW, Cp), lambda n, t: (n, 0, 0)),
            scratch_shapes=[pltpu.VMEM((1, Cp), jnp.float32),
                            pltpu.VMEM((1, Cp), jnp.float32)],
        ),
        compiler_params=pltpu.CompilerParams(
            dimension_semantics=("parallel", "arbitrary"),
            vmem_limit_bytes=vmem_limit),
        cost_estimate=cost,
    )(patches, w_flat)

    if Cp != Cout:
        out = out[:, :, :Cout]
    if channels_last_out:
        return out.reshape(N, Ho, Wo, Cout)
    # NCHW to match the PyTorch module's forward-pass semantics.
    return jnp.transpose(out.reshape(N, Ho, Wo, Cout), (0, 3, 1, 2))


def _reference(x, weight):
    # Pure-JAX f32 reference (conv -> instance norm -> leaky relu).
    y = lax.conv_general_dilated(
        x, weight, window_strides=(2, 2), padding=((1, 1), (1, 1)),
        dimension_numbers=("NCHW", "OIHW", "NCHW"))
    mean = jnp.mean(y, axis=(2, 3), keepdims=True)
    var = jnp.mean((y - mean) ** 2, axis=(2, 3), keepdims=True)
    yn = (y - mean) * lax.rsqrt(var + EPS)
    return jnp.where(yn >= 0, yn, NEG_SLOPE * yn)


if __name__ == "__main__":
    key = jax.random.PRNGKey(0)
    k1, k2, k3, k4 = jax.random.split(key, 4)

    # Case 1: toy shape; Cout=8 -> padded to 128 lanes; hw_tile=32 forces
    # 2 HW tiles (streamed-stats + finalize path).
    N, Cin, Cout, H, W = 2, 4, 8, 16, 16
    x = jax.random.normal(k1, (N, Cin, H, W), dtype=jnp.float32)
    w = 0.1 * jax.random.normal(k2, (Cout, Cin, 4, 4), dtype=jnp.float32)
    out = jax.block_until_ready(unet_down(x, w, hw_tile=32))
    ref = _reference(x, w)
    assert out.shape == (N, Cout, H // 2, W // 2), out.shape
    err1 = float(jnp.max(jnp.abs(out - ref)))
    assert jnp.allclose(out, ref, atol=2e-2, rtol=2e-2), err1

    # Case 2: Cout=256 handled in a single full-width block (patches streamed
    # once) with 4 HW tiles.
    N, Cin, Cout, H, W = 1, 8, 256, 16, 16
    x = jax.random.normal(k3, (N, Cin, H, W), dtype=jnp.float32)
    w = 0.1 * jax.random.normal(k4, (Cout, Cin, 4, 4), dtype=jnp.float32)
    out = jax.block_until_ready(unet_down(x, w, hw_tile=16))
    ref = _reference(x, w)
    assert out.shape == (N, Cout, H // 2, W // 2), out.shape
    err2 = float(jnp.max(jnp.abs(out - ref)))
    assert jnp.allclose(out, ref, atol=2e-2, rtol=2e-2), err2

    # Case 3: default (auto) hw_tile path — single tile, init+finalize fused.
    out = jax.block_until_ready(unet_down(x, w))
    assert jnp.allclose(out, ref, atol=2e-2, rtol=2e-2)

    print("KERNEL_OK")
</pallas_src>

<mosaic_0001>
module attributes {stable_mosaic.version = 11 : i64} {
  func.func @_unet_down_kernel(%arg0: i32, %arg1: i32, %arg2: memref<1x32x64xbf16, #tpu.memory_space<vmem>>, %arg3: memref<64x128xbf16, #tpu.memory_space<vmem>>, %arg4: memref<1x64x128xf32, #tpu.memory_space<vmem>>, %arg5: memref<1x128xf32, #tpu.memory_space<vmem>>, %arg6: memref<1x128xf32, #tpu.memory_space<vmem>>) attributes {dimension_semantics = [#tpu.dimension_semantics<parallel>, #tpu.dimension_semantics<arbitrary>], iteration_bounds = array<i64: 2, 2>, scalar_prefetch = 0 : i64, scratch_operands = 2 : i64, tpu.core_type = #tpu.core_type<tc>, window_params = [{transform_indices = @transform_0, window_bounds = array<i64: 1, 32, 64>}, {pipeline_mode = #tpu.pipeline_mode<synchronous>, transform_indices = @transform_1, window_bounds = array<i64: 64, 128>}, {transform_indices = @transform_2, window_bounds = array<i64: 1, 64, 128>}]} {
    %c0_i32 = arith.constant 0 : i32
    %0 = arith.cmpi eq, %arg1, %c0_i32 : i32
    %1 = arith.extui %0 : i1 to i32
    %c0_i32_0 = arith.constant 0 : i32
    %2 = arith.cmpi ne, %1, %c0_i32_0 : i32
    scf.if %2 {
      %cst_18 = arith.constant 0.000000e+00 : f32
      %27 = vector.broadcast %cst_18 : f32 to vector<1x128xf32>
      %c0_19 = arith.constant 0 : index
      %c0_20 = arith.constant 0 : index
      %28 = vector.load %arg5[%c0_19, %c0_20] : memref<1x128xf32, #tpu.memory_space<vmem>>, vector<1x128xf32>
      tpu.vector_store %arg5[%c0_19, %c0_20], %27 {strides = array<i32>} : memref<1x128xf32, #tpu.memory_space<vmem>>, vector<1x128xf32>,
      %cst_21 = arith.constant 0.000000e+00 : f32
      %29 = vector.broadcast %cst_21 : f32 to vector<1x128xf32>
      %c0_22 = arith.constant 0 : index
      %c0_23 = arith.constant 0 : index
      %30 = vector.load %arg6[%c0_22, %c0_23] : memref<1x128xf32, #tpu.memory_space<vmem>>, vector<1x128xf32>
      tpu.vector_store %arg6[%c0_22, %c0_23], %29 {strides = array<i32>} : memref<1x128xf32, #tpu.memory_space<vmem>>, vector<1x128xf32>,
    } else {
    }
    %c0 = arith.constant 0 : index
    %c0_1 = arith.constant 0 : index
    %c0_2 = arith.constant 0 : index
    %3 = vector.load %arg2[%c0, %c0_1, %c0_2] : memref<1x32x64xbf16, #tpu.memory_space<vmem>>, vector<1x32x64xbf16>
    %4 = vector.shape_cast %3 : vector<1x32x64xbf16> to vector<32x64xbf16>
    %c0_3 = arith.constant 0 : index
    %c0_4 = arith.constant 0 : index
    %5 = vector.load %arg3[%c0_3, %c0_4] : memref<64x128xbf16, #tpu.memory_space<vmem>>, vector<64x128xbf16>
    %cst = arith.constant dense<0.000000e+00> : vector<32x128xf32>
    %6 = tpu.matmul %4, %5, %cst {dimension_numbers = #tpu.dot_dimension_numbers<[1], [0], [0], [1], [0, 0, 1, 1], [], []>} : vector<32x64xbf16>, vector<64x128xbf16>, vector<32x128xf32> -> vector<32x128xf32>
    %c0_5 = arith.constant 0 : index
    %c0_6 = arith.constant 0 : index
    %7 = vector.load %arg5[%c0_5, %c0_6] : memref<1x128xf32, #tpu.memory_space<vmem>>, vector<1x128xf32>
    %cst_7 = arith.constant dense<0.000000e+00> : vector<128xf32>
    %8 = vector.multi_reduction <add>, %6, %cst_7 [0] : vector<32x128xf32> to vector<128xf32>
    %9 = vector.shape_cast %8 : vector<128xf32> to vector<1x128xf32>
    %10 = arith.addf %7, %9 : vector<1x128xf32>
    %c0_8 = arith.constant 0 : index
    %c0_9 = arith.constant 0 : index
    %11 = vector.load %arg5[%c0_8, %c0_9] : memref<1x128xf32, #tpu.memory_space<vmem>>, vector<1x128xf32>
    tpu.vector_store %arg5[%c0_8, %c0_9], %10 {strides = array<i32>} : memref<1x128xf32, #tpu.memory_space<vmem>>, vector<1x128xf32>,
    %c0_10 = arith.constant 0 : index
    %c0_11 = arith.constant 0 : index
    %12 = vector.load %arg6[%c0_10, %c0_11] : memref<1x128xf32, #tpu.memory_space<vmem>>, vector<1x128xf32>
    %13 = arith.mulf %6, %6 : vector<32x128xf32>
    %cst_12 = arith.constant dense<0.000000e+00> : vector<128xf32>
    %14 = vector.multi_reduction <add>, %13, %cst_12 [0] : vector<32x128xf32> to vector<128xf32>
    %15 = vector.shape_cast %14 : vector<128xf32> to vector<1x128xf32>
    %16 = arith.addf %12, %15 : vector<1x128xf32>
    %c0_13 = arith.constant 0 : index
    %c0_14 = arith.constant 0 : index
    %17 = vector.load %arg6[%c0_13, %c0_14] : memref<1x128xf32, #tpu.memory_space<vmem>>, vector<1x128xf32>
    tpu.vector_store %arg6[%c0_13, %c0_14], %16 {strides = array<i32>} : memref<1x128xf32, #tpu.memory_space<vmem>>, vector<1x128xf32>,
    %c32_i32 = arith.constant 32 : i32
    %18 = arith.muli %arg1, %c32_i32 : i32
    %19 = tpu.assume_multiple %18, 32 : i32
    %c0_15 = arith.constant 0 : index
    %20 = arith.index_cast %19 : i32 to index
    %c0_16 = arith.constant 0 : index
    %21 = vector.load %arg4[%c0_15, %20, %c0_16] : memref<1x64x128xf32, #tpu.memory_space<vmem>>, vector<1x32x128xf32>
    %22 = vector.shape_cast %21 : vector<1x32x128xf32> to vector<32x128xf32>
    %23 = vector.shape_cast %6 : vector<32x128xf32> to vector<1x32x128xf32>
    tpu.vector_store %arg4[%c0_15, %20, %c0_16], %23 {strides = array<i32>} : memref<1x64x128xf32, #tpu.memory_space<vmem>>, vector<1x32x128xf32>,
    %c1_i32 = arith.constant 1 : i32
    %24 = arith.cmpi eq, %arg1, %c1_i32 : i32
    %25 = arith.extui %24 : i1 to i32
    %c0_i32_17 = arith.constant 0 : i32
    %26 = arith.cmpi ne, %25, %c0_i32_17 : i32
    scf.if %26 {
      %c0_18 = arith.constant 0 : index
      %c0_19 = arith.constant 0 : index
      %27 = vector.load %arg5[%c0_18, %c0_19] : memref<1x128xf32, #tpu.memory_space<vmem>>, vector<1x128xf32>
      %cst_20 = arith.constant 1.562500e-02 : f32
      %28 = vector.broadcast %cst_20 : f32 to vector<1x128xf32>
      %29 = arith.mulf %27, %28 : vector<1x128xf32>
      %c0_21 = arith.constant 0 : index
      %c0_22 = arith.constant 0 : index
      %30 = vector.load %arg6[%c0_21, %c0_22] : memref<1x128xf32, #tpu.memory_space<vmem>>, vector<1x128xf32>
      %cst_23 = arith.constant 1.562500e-02 : f32
      %31 = vector.broadcast %cst_23 : f32 to vector<1x128xf32>
      %32 = arith.mulf %30, %31 : vector<1x128xf32>
      %33 = arith.mulf %29, %29 : vector<1x128xf32>
      %34 = arith.subf %32, %33 : vector<1x128xf32>
      %cst_24 = arith.constant 0.000000e+00 : f32
      %35 = vector.broadcast %cst_24 : f32 to vector<1x128xf32>
      %36 = arith.maximumf %34, %35 : vector<1x128xf32>
      %cst_25 = arith.constant 9.99999974E-6 : f32
      %37 = vector.broadcast %cst_25 : f32 to vector<1x128xf32>
      %38 = arith.addf %36, %37 : vector<1x128xf32>
      %39 = math.rsqrt %38 : vector<1x128xf32>
      %40 = vector.shape_cast %29 : vector<1x128xf32> to vector<1x128xf32>
      %41 = vector.broadcast %40 : vector<1x128xf32> to vector<32x128xf32>
      %42 = vector.shape_cast %39 : vector<1x128xf32> to vector<1x128xf32>
      %43 = vector.broadcast %42 : vector<1x128xf32> to vector<32x128xf32>
      %c0_i32_26 = arith.constant 0 : i32
      %c32_i32_27 = arith.constant 32 : i32
      %44 = arith.muli %c0_i32_26, %c32_i32_27 : i32
      %45 = tpu.assume_multiple %44, 32 : i32
      %c0_28 = arith.constant 0 : index
      %46 = arith.index_cast %45 : i32 to index
      %c0_29 = arith.constant 0 : index
      %47 = vector.load %arg4[%c0_28, %46, %c0_29] : memref<1x64x128xf32, #tpu.memory_space<vmem>>, vector<1x32x128xf32>
      %48 = vector.shape_cast %47 : vector<1x32x128xf32> to vector<32x128xf32>
      %49 = arith.subf %48, %41 : vector<32x128xf32>
      %50 = arith.mulf %49, %43 : vector<32x128xf32>
      %cst_30 = arith.constant 0.000000e+00 : f32
      %51 = vector.broadcast %cst_30 : f32 to vector<32x128xf32>
      %52 = arith.cmpf oge, %50, %51 : vector<32x128xf32>
      %cst_31 = arith.constant 2.000000e-01 : f32
      %53 = vector.broadcast %cst_31 : f32 to vector<32x128xf32>
      %54 = arith.mulf %53, %50 : vector<32x128xf32>
      %55 = arith.select %52, %50, %54 : vector<32x128xi1>, vector<32x128xf32>
      %c0_32 = arith.constant 0 : index
      %56 = arith.index_cast %45 : i32 to index
      %c0_33 = arith.constant 0 : index
      %57 = vector.load %arg4[%c0_32, %56, %c0_33] : memref<1x64x128xf32, #tpu.memory_space<vmem>>, vector<1x32x128xf32>
      %58 = vector.shape_cast %57 : vector<1x32x128xf32> to vector<32x128xf32>
      %59 = vector.shape_cast %55 : vector<32x128xf32> to vector<1x32x128xf32>
      tpu.vector_store %arg4[%c0_32, %56, %c0_33], %59 {strides = array<i32>} : memref<1x64x128xf32, #tpu.memory_space<vmem>>, vector<1x32x128xf32>,
      %c1_i32_34 = arith.constant 1 : i32
      %c32_i32_35 = arith.constant 32 : i32
      %60 = arith.muli %c1_i32_34, %c32_i32_35 : i32
      %61 = tpu.assume_multiple %60, 32 : i32
      %c0_36 = arith.constant 0 : index
      %62 = arith.index_cast %61 : i32 to index
      %c0_37 = arith.constant 0 : index
      %63 = vector.load %arg4[%c0_36, %62, %c0_37] : memref<1x64x128xf32, #tpu.memory_space<vmem>>, vector<1x32x128xf32>
      %64 = vector.shape_cast %63 : vector<1x32x128xf32> to vector<32x128xf32>
      %65 = arith.subf %64, %41 : vector<32x128xf32>
      %66 = arith.mulf %65, %43 : vector<32x128xf32>
      %cst_38 = arith.constant 0.000000e+00 : f32
      %67 = vector.broadcast %cst_38 : f32 to vector<32x128xf32>
      %68 = arith.cmpf oge, %66, %67 : vector<32x128xf32>
      %cst_39 = arith.constant 2.000000e-01 : f32
      %69 = vector.broadcast %cst_39 : f32 to vector<32x128xf32>
      %70 = arith.mulf %69, %66 : vector<32x128xf32>
      %71 = arith.select %68, %66, %70 : vector<32x128xi1>, vector<32x128xf32>
      %c0_40 = arith.constant 0 : index
      %72 = arith.index_cast %61 : i32 to index
      %c0_41 = arith.constant 0 : index
      %73 = vector.load %arg4[%c0_40, %72, %c0_41] : memref<1x64x128xf32, #tpu.memory_space<vmem>>, vector<1x32x128xf32>
      %74 = vector.shape_cast %73 : vector<1x32x128xf32> to vector<32x128xf32>
      %75 = vector.shape_cast %71 : vector<32x128xf32> to vector<1x32x128xf32>
      tpu.vector_store %arg4[%c0_40, %72, %c0_41], %75 {strides = array<i32>} : memref<1x64x128xf32, #tpu.memory_space<vmem>>, vector<1x32x128xf32>,
      %c2_i32 = arith.constant 2 : i32
    } else {
    }
    return
  }
  func.func @transform_0(%arg0: i32, %arg1: i32) -> (i32, i32, i32) {
    %c0_i32 = arith.constant 0 : i32
    %c0_i32_0 = arith.constant 0 : i32
    return %arg0, %arg1, %c0_i32 : i32, i32, i32
  }
  func.func @transform_1(%arg0: i32, %arg1: i32) -> (i32, i32) {
    %c0_i32 = arith.constant 0 : i32
    %c0_i32_0 = arith.constant 0 : i32
    %c0_i32_1 = arith.constant 0 : i32
    return %c0_i32, %c0_i32_0 : i32, i32
  }
  func.func @transform_2(%arg0: i32, %arg1: i32) -> (i32, i32, i32) {
    %c0_i32 = arith.constant 0 : i32
    %c0_i32_0 = arith.constant 0 : i32
    %c0_i32_1 = arith.constant 0 : i32
    return %arg0, %c0_i32, %c0_i32_0 : i32, i32, i32
  }
}

</mosaic_0001>

<bundles_post_ra>
// kernel: tpu_custom_call.1
= control target key start
LH: loop header
LB: loop body
LE: loop exit
PB: predicated region body
PF: predicated region fallthrough
CT: control target
= control target key end

     0   :  { %s1171_s0 = inlined_call_operand.hbm [shape: bf16[2,64,64], index: 0, kind: input, shape index: {}]   ;;  %s1172_s1 = inlined_call_operand.hbm [shape: bf16[64,128], index: 1, kind: input, shape index: {}]   ;;  %s1173_s2 = inlined_call_operand.hbm [shape: f32[2,64,128], index: 2, kind: output, shape index: {}]  }
   0x1   :  { %1183 = sst [smem:[#allocation17_spill]] %s1172_s1 }
   0x2   :  { %1184 = sst [smem:[#allocation18_spill]] %s1173_s2 }
   0x3   :  { %7 = vsyncpa [#allocation5], 0 }
   0x4   :  { %9 = vsyncpa [#allocation5 + $0x1], 0 }
   0x5   :  { %10 = vsyncpa [#allocation8], 0 }
   0x6   :  { %11 = vsyncpa [#allocation6], 0 }
   0x7   :  { %13 = vsyncpa [#allocation6 + $0x1], 0  ;;  %s917_s9 = smov 0   ;;  %s919_s10 = smov 0  }
   0x8   :  { %s921_s11 = smov 0   ;;  %s923_s12 = smov 0  }
   0x9   :  { %s925_s13 = smov 0   ;;  %s927_s14 = smov 0  }
   0xa   :  { %s929_s15 = smov 0   ;;  %s931_s16 = smov 0  }
   0xb   :  { %s933_s17 = smov 0   ;;  %s935_s18 = smov 0  }
   0xc   :  { %s937_s19 = smov 0  }
   0xd LB: > { %1185 = sst [smem:[#allocation13_spill]] %s852_s9  ;;  %s532_s20 = sadd.s32 4294967295, %s892_s19   ;;  %s892_s19 = sphi %s937_s19, %s19_s19   ;;  %s888_s18 = sphi %s935_s18, %s1216_s18   ;;  %s884_s17 = sphi %s933_s17, %s1215_s17   ;;  %s880_s16 = sphi %s931_s16, %s1214_s16   ;;  %s876_s15 = sphi %s929_s15, %s1213_s15   ;;  %s872_s14 = sphi %s927_s14, %s1212_s14   ;;  %s868_s13 = sphi %s925_s13, %s1211_s13   ;;  %s864_s12 = sphi %s923_s12, %s1210_s12   ;;  %s860_s11 = sphi %s921_s11, %s1209_s11   ;;  %s856_s10 = sphi %s919_s10, %s1208_s10   ;;  %s852_s9 = sphi %s917_s9, %s1207_s9  }
   0xe   : > { %s533_s21 = sadd.s32 4294967294, %s892_s19   ;;  %p53_p0 = scmp.ne.s32.totalorder %s868_s13, %s864_s12 }
   0xf   : > { %p973_p1 = scmp.eq.s32.totalorder %s532_s20, 0  ;;  %s87_s23 = sadd.s32 1, %s860_s11 }
  0x10   : > { %p97_p2 = scmp.ne.s32.totalorder %s860_s11, %s856_s10  ;;  %p98_p4 = scmp.eq.s32.totalorder %s532_s20, 3 }
  0x11   : > { %p982_p3 = por %p973_p1, %p53_p0  ;;  %p103_p5 = scmp.ne.s32.totalorder %s856_s10, %s852_s9 }
  0x12   : > { %p104_p6 = scmp.eq.s32.totalorder %s533_s21, 3  ;;  %p988_p7 = por %p98_p4, %p97_p2 }
  0x13   : > { %p534_p8 = scmp.ge.s32.totalorder %s892_s19, 1  ;;  %p111_p10 = scmp.lt.s32.totalorder %s892_s19, 5 }
  0x14   : > { %s1188_s25 = scalar_select %p988_p7, 1, 0 }
  0x15   : > { %p993_p9 = por %p104_p6, %p103_p5  ;;  %p998_p11 = pnand %p534_p8, %p111_p10 }
  0x16   : > { %1189 = sst [smem:[#allocation14_spill]] %s1188_s25  ;;  %s894_s28 = smov [#allocation7]  }
  0x17   : > { %s1190_s26 = scalar_select %p993_p9, 1, 0 }
  0x18   : > { %s123_s29 = sshll.u32 %s894_s28, 4  ;;  %p596_p12 = pneg %p998_p11  ;;  %s124_s29 = int_to_ptr.vmem [resolvable:$true] %s123_s29 }
  0x19   : > { %1191 = sst [smem:[#allocation15_spill]] %s1190_s26  ;;  %s725_s30 = scalar_lea.vmem %s124_s29, 512 }
  0x1a   : > { %p597_p13 = pnand %p596_p12, %p973_p1  ;;  %p726_p2 = scmp.ne.s32.totalorder %s124_s29, %s725_s30 }
  0x1b   : > { %p733_p6 = scmp.lt.s32.totalorder %s124_s29, %s124_s29  ;;  %p734_p9 = scmp.lt.s32.totalorder %s725_s30, %s725_s30 }
  0x1c   : > { %p716_p0 = pneg %p597_p13 }
  0x1d   : > { %p735_p7 = por %p734_p9, %p733_p6 }
  0x1e   : > { %p728_p4 = pnand %p726_p2, %p716_p0 }
  0x20   : > { %p729_p5 = pneg %p728_p4 }
  0x22   : > { %p736_p8 = pnand %p735_p7, %p729_p5 }
  0x24   : > { %739 = shalt.err (!%p736_p8)
}
  0x25   : > { %s1175_s3 = smov 64   ;;  %s1176_s4 = smov 4  }
  0x26   : > { %s1193_s1 = sld [smem:[#allocation17_spill]]  ;;  %s28_s7 = sadd.s32 1, %s884_s17 }
  0x27   : > { %p29_p7 = scmp.ge.s32.totalorder %s28_s7, 2  ;;  %s31_s8 = sadd.s32 1, %s888_s18 }
  0x28   : > { %s40_s12 = sadd.s32 1, %s872_s14  ;;  %p47_p9 = scmp.ne.s32.totalorder %s872_s14, %s868_s13 }
  0x29   : > { %s1218_s7 = smov (%p29_p7, %s28_s7), 0  ;;  %s1220_s8 = smov (!%p29_p7, %s31_s8), %s888_s18 }
  0x2a   : > { %1194 = sst [smem:[#allocation16_spill]] %s1218_s7  ;;  %s36_s20 = ssub.s32 %s884_s17, %s1218_s7 }
  0x2b   : > { %p48_p10 = scmp.eq.s32.totalorder %s892_s19, 0  ;;  %p33_p12 = scmp.ge.s32.totalorder %s1220_s8, 2 }
  0x2c   : > { %599 = dma.hbm_to_vmem [thread:$0]  (!%p597_p13), %s1193_s1, 512, %s124_s29, [#allocation8], %s1175_s3, %s1175_s3, %s1176_s4  }
  0x2d   : > { %p609_p0 = scmp.lt.s32.totalorder %s892_s19, 4  ;;  %p1024_p13 = por %p48_p10, %p47_p9 }
  0x2e   : > { %s137_s28 = sand.u32 1, %s872_s14   ;;  %s1222_s8 = smov (%p33_p12, %s1220_s8), 0 }
  0x2f   : > { %s537_s29 = sshll.u32 %s137_s28, 4  ;;  %s35_s30 = ssub.s32 %s888_s18, %s1222_s8 }
  0x30   : > { %s37_s5 = sor.u32 %s36_s20, %s35_s30  ;;  %p85_p2 = scmp.eq.s32.totalorder %s35_s30, 0 }
  0x31   : > { %p38_p4 = scmp.eq.s32.totalorder %s37_s5, 0  ;;  %s538_s6 = sshll.u32 %s884_s17, 2 }
  0x32   : > { %s1037_s3 = scalar_select %p85_p2, %s860_s11, %s87_s23  }
  0x33   : > { %s1040_s4 = scalar_select %p38_p4, %s872_s14, %s40_s12  }
  0x34   : > { %s539_s1 = sshll.u32 %s888_s18, 3  ;;  %s141_s7 = scalar_lea.vmem [#allocation4], %s537_s29 }
  0x35   : > { %s150_s26 = sshll.u32 %s141_s7, 4  ;;  %s147_s9 = sadd.s32 %s539_s1, %s538_s6  ;;  %s151_s26 = int_to_ptr.vmem [resolvable:$true] %s150_s26 }
  0x36   : > { %s540_s2 = sshll.u32 %s147_s9, 6  ;;  %p1047_p5 = pnand %p609_p0, %p1024_p13 }
  0x37   : > { %s149_s23 = scalar_lea.hbm %s1171_s0, %s540_s2  ;;  %s138_s5 = scalar_lea.sflag [#allocation5], %s137_s28 }
  0x38   : > { %p742_p6 = pneg %p1047_p5  ;;  %s753_s12 = scalar_lea.vmem %s151_s26, 256 }
  0x39   : > { %p754_p8 = scmp.ne.s32.totalorder %s151_s26, %s753_s12  ;;  %s897_s1 = smov [#allocation4]  }
  0x3a   : > { %s758_s9 = sshll.u32 %s897_s1, 4  ;;  %s759_s9 = int_to_ptr.vmem [resolvable:$false] %s758_s9 }
  0x3b   : > { %p756_p7 = pnand %p754_p8, %p742_p6  ;;  %s760_s7 = scalar_lea.vmem %s759_s9, 512 }
  0x3c   : > { %p761_p10 = scmp.lt.s32.totalorder %s151_s26, %s759_s9  ;;  %p762_p12 = scmp.lt.s32.totalorder %s760_s7, %s753_s12 }
  0x3d   : > { %p757_p9 = pneg %p756_p7 }
  0x3e   : > { %p763_p0 = por %p762_p12, %p761_p10 }
  0x40   : > { %p764_p13 = pnand %p763_p0, %p757_p9 }
  0x42   : > { %767 = shalt.err (!%p764_p13)
}
  0x43   : > { %s1197_s21 = smov 4   ;;  %s1198_s2 = smov 64  }
  0x44   : > { %603 = dma.hbm_to_vmem [thread:$0]  (!%p1047_p5), %s149_s23, 256, %s151_s26, %s138_s5, %s1198_s2, %s1198_s2, %s1197_s21  }
  0x45   : > { %162 = sbr.rel (%p998_p11) target bundleno = 394 (0x18a), region = 28  ;;  %s164_s28 = sand.u32 (!%p998_p11), 1, %s868_s13  }
  0x46   : > { %s1064_s29 = sshll.u32 (!%p998_p11), %s164_s28, 4  ;;  %s165_s6 = scalar_lea.sflag (!%p998_p11), [#allocation5], %s164_s28 }
  0x47   : > { %s168_s20 = scalar_lea.vmem (!%p998_p11), [#allocation4], %s1064_s29 }
  0x4a   : > { %839 = dma.done.wait (%p982_p3), %s165_s6, 256  }
  0x4b   : > { %841 = vsyncadd (%p982_p3), %s165_s6, 4294967040 }
  0x4c   : > { %843 = dma.done.wait (%p973_p1), [#allocation8], 512  }
  0x4d   : > { %845 = vsyncadd (%p973_p1), [#allocation8], 4294966784  ;;  %s190_s25 = sand.u32 1, %s856_s10   ;;  %p545_p11 = scmp.ne.s32.totalorder %s876_s15, 0 }
  0x4e   : > { %s544_s26 = sshll.u32 %s190_s25, 6 }
  0x4f   : > { %s1078_s27 = scalar_lea.vmem [#allocation9], %s544_s26  ;;  %198 = sbr.rel (%p545_p11) target bundleno = 86 (0x56), region = 40 }
  0x54   : > { %v898_v0 = vmov 0.0  }
  0x55   : > { %199 = vst [vmem:[#allocation2] sm:$0x1] %v898_v0  ;;  %200 = vst [vmem:[#allocation3] sm:$0x1] %v898_v0 }
  0x56 PF: > { %v706_v1 = vld [vmem:[#allocation7 + $0x18] sm:$0xff]   ;;  %v707_v2 = vld [vmem:[#allocation7 + $0x10] sm:$0xff]   ;;  %v708_v3 = vld [vmem:[#allocation7 + $0x8] sm:$0xff]   ;;  %vm247_vm0 = vcmask 523264   ;;  %s554_s22 = sshll.u32 %s876_s15, 5  ;;  %p555_p1 = scmp.ne.s32.totalorder %s876_s15, 1 }
  0x57   : > { %576 = vmatprep.subr.bf16.mxu0 %v706_v1  ;;  %v710_v4 = vld [vmem:[%s168_s20] sm:$0xff]   ;;  %v711_v6 = vld [vmem:[%s168_s20 + $0x8] sm:$0xff]   ;;  %s332_s24 = scalar_lea.vmem %s1078_s27, %s554_s22 [#allocation9] }
  0x58   : > { %577 = vmatpush3.bf16.msra.mxu0 %v706_v1  ;;  %584 = vmatprep.mubr.msk.bf16.mxu0 %vm247_vm0, %v710_v4  ;;  %v709_v5 = vld [vmem:[#allocation7] sm:$0xff]  }
  0x59   : > { %578 = vmatprep.subr.bf16.mxu0 %v707_v2 }
  0x5c   : > { %579 = vmatpush3.bf16.msra.mxu0 %v707_v2  ;;  %v303_v30 = vld [vmem:[#allocation2] sm:$0x1]  ;;  %v315_v33 = vld [vmem:[#allocation3] sm:$0x1] }
  0x5d   : > { %580 = vmatprep.subr.bf16.mxu0 %v708_v3 }
  0x60   : > { %581 = vmatpush3.bf16.msra.mxu0 %v708_v3 }
  0x61   : > { %582 = vmatprep.subr.bf16.mxu0 %v709_v5 }
  0x64   : > { %583 = vmatpush3.bf16.msra.mxu0 %v709_v5 }
  0x67   : > { %585 = vmatmul.mubr.msk.bf16.vlgmr.msra.gmra.mxu0 %vm247_vm0, %v711_v6 }
 0x127   : > { %v586_v7 = vpop.f32.mrf.mxu0 }
 0x128   : > { %335 = vst [vmem:[%s332_s24 + $0x10] sm:$0xff] %v586_v7  ;;  %v318_v14 = vmul.f32 %v586_v7, %v586_v7 }
 0x129   : > { %v288_v8 = vpop.f32.mrf.mxu0 }
 0x12a   : > { %333 = vst [vmem:[%s332_s24] sm:$0xff] %v288_v8  ;;  %v316_v11 = vmul.f32 %v288_v8, %v288_v8 }
 0x12b   : > { %v587_v9 = vpop.f32.mrf.mxu0 }
 0x12c   : > { %336 = vst [vmem:[%s332_s24 + $0x18] sm:$0xff] %v587_v9  ;;  %v319_v17 = vmul.f32 %v587_v9, %v587_v9 }
 0x12d   : > { %v291_v10 = vpop.f32.mrf.mxu0 }
 0x12e   : > { %v304_v12 = vadd.f32 %v291_v10, %v288_v8  ;;  %v317_v13 = vmul.f32 %v291_v10, %v291_v10  ;;  %334 = vst [vmem:[%s332_s24 + $0x8] sm:$0xff] %v291_v10 }
 0x130   : > { %v305_v15 = vadd.f32 %v586_v7, %v304_v12  ;;  %v320_v16 = vadd.f32 %v317_v13, %v316_v11 }
 0x132   : > { %v306_v18 = vadd.f32 %v587_v9, %v305_v15  ;;  %v321_v19 = vadd.f32 %v320_v16, %v318_v14 }
 0x134   : > { %v307_v20 = vrot.slane %v306_v18, 4  ;;  %v322_v21 = vadd.f32 %v321_v19, %v319_v17 }
 0x136   : > { %v308_v22 = vadd.f32 %v307_v20, %v306_v18  ;;  %v323_v23 = vrot.slane %v322_v21, 4 }
 0x138   : > { %v309_v24 = vrot.slane %v308_v22, 2  ;;  %v324_v25 = vadd.f32 %v323_v23, %v322_v21 }
 0x13a   : > { %v310_v26 = vadd.f32 %v309_v24, %v308_v22  ;;  %v325_v27 = vrot.slane %v324_v25, 2 }
 0x13c   : > { %v311_v28 = vrot.slane %v310_v26, 1  ;;  %v326_v29 = vadd.f32 %v325_v27, %v324_v25 }
 0x13e   : > { %v312_v31 = vadd.f32 %v311_v28, %v310_v26  ;;  %v327_v32 = vrot.slane %v326_v29, 1 }
 0x140   : > { %v313_v34 = vadd.f32 %v312_v31, %v303_v30  ;;  %v328_v35 = vadd.f32 %v327_v32, %v326_v29  ;;  %340 = sbr.rel (%p555_p1) target bundleno = 367 (0x16f), region = 44 }
 0x142   : > { %314 = vst [vmem:[#allocation2] sm:$0x1] %v313_v34  ;;  %v329_v36 = vadd.f32 %v328_v35, %v315_v33 }
 0x144   : > { %330 = vst [vmem:[#allocation3] sm:$0x1] %v329_v36 }
 0x145   : > { %v351_v44 = vlaneseq  ;;  %v362_v49 = vld [vmem:[%s1078_s27] sm:$0xff]  ;;  %v363_v50 = vld [vmem:[%s1078_s27 + $0x8] sm:$0xff]  ;;  %v364_v51 = vld [vmem:[%s1078_s27 + $0x10] sm:$0xff] }
 0x146   : > { %v365_v52 = vld [vmem:[%s1078_s27 + $0x18] sm:$0xff]  ;;  %v556_v53 = vld [vmem:[%s1078_s27 + $0x20] sm:$0xff]  ;;  %v557_v54 = vld [vmem:[%s1078_s27 + $0x28] sm:$0xff] }
 0x147   : > { %v352_v46 = vshrl.u32 %v351_v44, 7  ;;  %v558_v55 = vld [vmem:[%s1078_s27 + $0x30] sm:$0xff]  ;;  %v559_v56 = vld [vmem:[%s1078_s27 + $0x38] sm:$0xff] }
 0x149   : > { %v341_v37 = vld [vmem:[#allocation2] sm:$0x1]  ;;  %v353_v47 = vsub.s32 0, %v352_v46 }
 0x14a   : > { %v342_v39 = vmul.f32 0.015625, %v341_v37 }
 0x14b   : > { %v343_v38 = vld [vmem:[#allocation3] sm:$0x1] }
 0x14c   : > { %v344_v40 = vmul.f32 0.015625, %v343_v38  ;;  %v345_v41 = vmul.f32 %v342_v39, %v342_v39  ;;  %v354_v48 = vrot.slane %v342_v39, %v353_v47 }
 0x14e   : > { %v346_v42 = vsub.f32 %v344_v40, %v345_v41  ;;  %v366_v57 = vsub.f32 %v362_v49, %v354_v48  ;;  %v367_v58 = vsub.f32 %v363_v50, %v354_v48  ;;  %v368_v59 = vsub.f32 %v364_v51, %v354_v48 }
 0x14f   : > { %v369_v60 = vsub.f32 %v365_v52, %v354_v48  ;;  %v395_v62 = vsub.f32 %v556_v53, %v354_v48  ;;  %v396_v63 = vsub.f32 %v557_v54, %v354_v48  ;;  %v397_v0 = vsub.f32 %v558_v55, %v354_v48 }
 0x150   : > { %v347_v43 = vmax.f32 %v346_v42, 0.0  ;;  %v398_v1 = vsub.f32 %v559_v56, %v354_v48 }
 0x152   : > { %v348_v45 = vadd.f32 1e-05, %v347_v43 }
 0x154   : > { %712 = vrsqrt.f32 %v348_v45 }
 0x161   : > { %v713_v61 = vpop.eup %712 }
 0x162   : > { %v360_v2 = vrot.slane %v713_v61, %v353_v47 }
 0x164   : > { %v370_v3 = vmul.f32 %v366_v57, %v360_v2  ;;  %v371_v4 = vmul.f32 %v367_v58, %v360_v2  ;;  %v372_v5 = vmul.f32 %v368_v59, %v360_v2  ;;  %v373_v6 = vmul.f32 %v369_v60, %v360_v2 }
 0x165   : > { %v399_v7 = vmul.f32 %v395_v62, %v360_v2  ;;  %v400_v8 = vmul.f32 %v396_v63, %v360_v2  ;;  %v401_v9 = vmul.f32 %v397_v0, %v360_v2  ;;  %v402_v10 = vmul.f32 %v398_v1, %v360_v2 }
 0x166   : > { %vm374_vm1 = vcmp.ge.f32.partialorder %v370_v3, 0.0  ;;  %v378_v11 = vmul.f32 0.2, %v370_v3  ;;  %vm375_vm2 = vcmp.ge.f32.partialorder %v371_v4, 0.0  ;;  %v379_v12 = vmul.f32 0.2, %v371_v4 }
 0x167   : > { %vm376_vm3 = vcmp.ge.f32.partialorder %v372_v5, 0.0  ;;  %v380_v13 = vmul.f32 0.2, %v372_v5  ;;  %vm377_vm4 = vcmp.ge.f32.partialorder %v373_v6, 0.0  ;;  %v381_v14 = vmul.f32 0.2, %v373_v6 }
 0x168   : > { %v382_v15 = vsel %vm374_vm1, %v370_v3, %v378_v11  ;;  %v383_v16 = vsel %vm375_vm2, %v371_v4, %v379_v12  ;;  %vm403_vm5 = vcmp.ge.f32.partialorder %v399_v7, 0.0  ;;  %v407_v17 = vmul.f32 0.2, %v399_v7 }
 0x169   : > { %386 = vst [vmem:[%s1078_s27] sm:$0xff] %v382_v15  ;;  %387 = vst [vmem:[%s1078_s27 + $0x8] sm:$0xff] %v383_v16  ;;  %v384_v18 = vsel %vm376_vm3, %v372_v5, %v380_v13  ;;  %v385_v19 = vsel %vm377_vm4, %v373_v6, %v381_v14  ;;  %vm404_vm6 = vcmp.ge.f32.partialorder %v400_v8, 0.0  ;;  %v408_v20 = vmul.f32 0.2, %v400_v8 }
 0x16a   : > { %388 = vst [vmem:[%s1078_s27 + $0x10] sm:$0xff] %v384_v18  ;;  %389 = vst [vmem:[%s1078_s27 + $0x18] sm:$0xff] %v385_v19  ;;  %v411_v21 = vsel %vm403_vm5, %v399_v7, %v407_v17  ;;  %vm405_vm7 = vcmp.ge.f32.partialorder %v401_v9, 0.0  ;;  %v409_v22 = vmul.f32 0.2, %v401_v9  ;;  %vm406_vm8 = vcmp.ge.f32.partialorder %v402_v10, 0.0 }
 0x16b   : > { %560 = vst [vmem:[%s1078_s27 + $0x20] sm:$0xff] %v411_v21  ;;  %v412_v23 = vsel %vm404_vm6, %v400_v8, %v408_v20  ;;  %v410_v24 = vmul.f32 0.2, %v402_v10 }
 0x16c   : > { %561 = vst [vmem:[%s1078_s27 + $0x28] sm:$0xff] %v412_v23  ;;  %v413_v25 = vsel %vm405_vm7, %v401_v9, %v409_v22 }
 0x16d   : > { %562 = vst [vmem:[%s1078_s27 + $0x30] sm:$0xff] %v413_v25  ;;  %v414_v26 = vsel %vm406_vm8, %v402_v10, %v410_v24 }
 0x16e   : > { %563 = vst [vmem:[%s1078_s27 + $0x38] sm:$0xff] %v414_v26 }
 0x16f PF: > { %s1199_s15 = sld [smem:[#allocation14_spill]]  ;;  %s569_s30 = sshll.u32 %s880_s16, 10 }
 0x170   : > { %s1200_s12 = sld [smem:[#allocation18_spill]]  ;;  %s433_s7 = sshll.u32 %s1078_s27, 4  ;;  %s1107_s7 = int_to_ptr.vmem [resolvable:$true] %s433_s7 }
 0x171   : > { %s1111_s21 = scalar_lea.sflag [#allocation6], %s190_s25  ;;  %s768_s2 = scalar_lea.vmem %s1107_s7, 1024 }
 0x172   : > { %p769_p3 = scmp.ne.s32.totalorder %s1107_s7, %s768_s2  ;;  %s899_s16 = smov [#allocation9]  }
 0x173   : > { %s772_s28 = sshll.u32 %s899_s16, 4  ;;  %s773_s28 = int_to_ptr.vmem [resolvable:$false] %s772_s28 }
 0x174   : > { %s774_s29 = scalar_lea.vmem %s773_s28, 2048  ;;  %p775_p6 = scmp.lt.s32.totalorder %s1107_s7, %s773_s28 }
 0x175   : > { %p1202_p2 = scmp.ne.s32.totalorder %s1199_s15, 0  ;;  %p776_p8 = scmp.lt.s32.totalorder %s774_s29, %s768_s2 }
 0x176   : > { %s1201_s1 = smov %s1200_s12  ;;  %s1104_s9 = scalar_lea.hbm %s1200_s12, %s569_s30 }
 0x177   : > { %p770_p4 = pnand %p769_p3, %p1202_p2  ;;  %p777_p7 = por %p776_p8, %p775_p6 }
 0x179   : > { %p771_p5 = pneg %p770_p4 }
 0x17b   : > { %p778_p9 = pnand %p777_p7, %p771_p5 }
 0x17d   : > { %781 = shalt.err (!%p778_p9)
}
 0x17e   : > { %s782_s6 = scalar_lea.hbm %s1104_s9, 1024  ;;  %s786_s26 = scalar_lea.hbm %s1201_s1, 2048 }
 0x17f   : > { %p783_p10 = scmp.ne.s32.totalorder %s1104_s9, %s782_s6  ;;  %p787_p13 = scmp.lt.s32.totalorder %s1104_s9, %s1201_s1 }
 0x180   : > { %p788_p11 = scmp.lt.s32.totalorder %s786_s26, %s782_s6 }
 0x181   : > { %p784_p12 = pnand %p783_p10, %p1202_p2 }
 0x182   : > { %p789_p1 = por %p788_p11, %p787_p13 }
 0x183   : > { %p785_p0 = pneg %p784_p12 }
 0x185   : > { %p790_p3 = pnand %p789_p1, %p785_p0 }
 0x187   : > { %793 = shalt.err (!%p790_p3)
}
 0x188   : > { %s900_s24 = smov 128   ;;  %s901_s30 = smov 8  }
 0x189   : > { %594 = dma.vmem_to_hbm [thread:$0]  (%p1202_p2), %s1107_s7, 1024, %s1104_s9, %s1111_s21, %s900_s24, %s900_s24, %s901_s30  }
 0x18a PF: > { %s1203_s23 = sld [smem:[#allocation13_spill]]  ;;  %p611_p4 = scmp.ge.s32.totalorder %s892_s19, 2 }
 0x18b   : > { %s1204_s5 = sld [smem:[#allocation15_spill]] }
 0x190   : > { %s448_s12 = sand.u32 1, %s1203_s23  }
 0x191   : > { %p1205_p5 = scmp.ne.s32.totalorder %s1204_s5, 0  ;;  %s449_s2 = scalar_lea.sflag [#allocation6], %s448_s12 }
 0x193   : > { %p605_p6 = pnand %p611_p4, %p1205_p5 }
 0x195   : > { %p606_p8 = pneg %p605_p6 }
 0x197   : > { %847 = dma.done.wait (%p606_p8), %s449_s2, 1024  }
 0x198   : > { %849 = vsyncadd (%p606_p8), %s449_s2, 4294966272  ;;  %s19_s19 = sadd.s32 1, %s892_s19   ;;  %s1206_s7 = sld [smem:[#allocation16_spill]] }
 0x199   : > { %p16_p7 = scmp.ge.s32.totalorder %s19_s19, 6   ;;  %s1207_s9 = smov %s856_s10 }
 0x19a   : > { %s1208_s10 = smov %s860_s11  ;;  %s1209_s11 = smov %s1037_s3 }
 0x19b   : > { %s1210_s12 = smov %s868_s13  ;;  %s1211_s13 = smov %s872_s14 }
 0x19c   : > { %s1212_s14 = smov %s1040_s4  ;;  %s1213_s15 = smov %s884_s17 }
 0x19d   : > { %s1214_s16 = smov %s888_s18  ;;  %s1216_s18 = smov %s1222_s8 }
 0x19e   : > { %s1215_s17 = smov %s1206_s7  ;;  %18 = sbr.rel (!%p16_p7) target bundleno = 13 (0xd), region = 87 }
 0x1a3   :  { %454 = vsyncpa [#allocation5], 1 }
 0x1a4   :  { %456 = vsyncpa [#allocation5 + $0x1], 1 }
 0x1a5   :  { %457 = vsyncpa [#allocation8], 1 }
 0x1a6   :  { %458 = vsyncpa [#allocation6], 1 }
 0x1a7   :  { %460 = vsyncpa [#allocation6 + $0x1], 1 }

</bundles_post_ra>
